<compile_context>
chip_gen: v5e
topology: v5e:2x2
jax: 0.10.0
libtpu: 0.0.40
codegen_flags: <defaults>
</compile_context>

<pallas_src>
import math

import jax
import jax.numpy as jnp
from jax import lax
from jax.experimental import pallas as pl
from jax.experimental.pallas import tpu as pltpu


def _round_up(v, m):
    return ((v + m - 1) // m) * m


# ----------------------------------------------------------------------------
# Fused forward pass (accepts / returns NCHW, like the PyTorch module)
# ----------------------------------------------------------------------------
def downsample_forward(x_nchw, params):
    w1, b1, w2, b2, w3, b3, w4, b4 = params          # OIHW conv weights
    N, C, H, W = x_nchw.shape
    Cb = w1.shape[0]
    Co = w3.shape[0]
    assert H % 2 == 0 and W % 2 == 0, "stride-2 downsample expects even H, W"
    Ho, Wo = H // 2, W // 2
    HW, HoWo = H * W, Ho * Wo

    # zero-halo geometry for the flattened 3x3 taps; 128-aligned so the
    # in-kernel store of the conv1 output lands on a lane-tile boundary.
    pad_side = _round_up(W + 1, 128)
    pad_tot = HW + 2 * pad_side

    # ---- operand prep (metadata-only reshapes, no data movement) ------------
    xf = x_nchw.reshape(N, C, HW)

    # conv1 + conv4 fused: one (Cb+Co, C) weight, one matmul against x.
    w14 = jnp.concatenate([w1.reshape(Cb, C), w4.reshape(Co, C)], axis=0)

    # conv2 reshaped for a single K=9*Cb matmul; column t*Cb+ci corresponds to
    # tap t = ky*3+kx, input channel ci (matches the in-kernel tap stacking).
    w2f = jnp.transpose(w2, (0, 2, 3, 1)).reshape(Cb, 9 * Cb)

    w3m = w3.reshape(Co, Cb)
    b1c = b1.reshape(Cb, 1)
    b2c = b2.reshape(Cb, 1)
    b34c = (b3 + b4).reshape(Co, 1)                   # combined residual bias

    # column masks cancelling left/right wrap-around of the flattened taps
    # (vertical out-of-image taps read the zero halo instead).
    col = jnp.arange(HW, dtype=jnp.int32) % W
    masks = jnp.stack([col != 0,                      # kx = 0 taps
                       jnp.ones((HW,), dtype=bool),   # kx = 1 taps (unused)
                       col != W - 1]                  # kx = 2 taps
                      ).astype(jnp.float32)           # (3, HW)

    # one-hot stride-2 selection: flat (2*ho, 2*wo) -> flat (ho, wo).
    # Exact 0/1 values -> stored as bf16 (halves the largest resident operand).
    j = jnp.arange(HoWo, dtype=jnp.int32)
    sel_rows = 2 * (j // Wo) * W + 2 * (j % Wo)
    sel = (jnp.arange(HW, dtype=jnp.int32)[:, None] == sel_rows[None, :]
           ).astype(jnp.bfloat16)                     # (HW, HoWo)

    def kernel(x_ref, w14_ref, b1_ref, w2_ref, b2_ref, w3_ref, b34_ref,
               mask_ref, sel_ref, o_ref, ext_ref):
        xf_blk = x_ref[0]                                           # (C, HW)

        # fused conv1(1x1) + conv4(1x1 at full res): one K=C matmul
        y14 = jnp.dot(w14_ref[...], xf_blk,
                      preferred_element_type=jnp.float32)           # (Cb+Co, HW)
        y1 = jnp.maximum(y14[:Cb, :] + b1_ref[...], 0.0)            # (Cb, HW)
        r4 = y14[Cb:, :]                                            # (Co, HW)

        # zero only the two halo slices (interior is fully overwritten below).
        zero_pad = jnp.zeros((Cb, pad_side), jnp.float32)
        ext_ref[:, :pad_side] = zero_pad
        ext_ref[:, pad_side + HW:] = zero_pad
        ext_ref[:, pad_side:pad_side + HW] = y1
        ext = ext_ref[...]                                          # (Cb, pad_tot)

        # conv2 (3x3, padding=1): stack the 9 shifted taps (column masks
        # pre-applied) along sublanes and do ONE K=9*Cb matmul on the MXU.
        taps = []
        for ky in range(3):
            for kx in range(3):
                start = pad_side + (ky - 1) * W + (kx - 1)
                tap = ext[:, start:start + HW]                      # (Cb, HW)
                if kx != 1:
                    tap = tap * mask_ref[kx:kx + 1, :]
                taps.append(tap)
        taps = jnp.concatenate(taps, axis=0)                        # (9*Cb, HW)
        y2 = jnp.dot(w2_ref[...], taps,
                     preferred_element_type=jnp.float32)            # (Cb, HW)
        y2 = jnp.maximum(y2 + b2_ref[...], 0.0)

        # conv3 + conv4 + combined bias at full resolution, then a SINGLE
        # stride-2 subsample (one sel matmul, K=HW) and the final ReLU.
        out_full = (jnp.dot(w3_ref[...], y2,
                            preferred_element_type=jnp.float32)
                    + r4 + b34_ref[...])                            # (Co, HW)
        selm = sel_ref[...].astype(jnp.float32)                     # exact 0/1
        out = jnp.dot(out_full, selm,
                      preferred_element_type=jnp.float32)           # (Co, HoWo)
        o_ref[0] = jnp.maximum(out, 0.0).astype(o_ref.dtype)

    flops = 2 * N * ((Cb + Co) * C * HW + Cb * (9 * Cb) * HW
                     + Co * Cb * HW + Co * HW * HoWo)
    bytes_accessed = (4 * (N * C * HW + N * Co * HoWo
                           + w14.size + w2f.size + w3m.size
                           + Cb + Cb + Co + masks.size)
                      + 2 * sel.size)

    out_flat = pl.pallas_call(
        kernel,
        out_shape=jax.ShapeDtypeStruct((N, Co, HoWo), x_nchw.dtype),
        grid_spec=pltpu.PrefetchScalarGridSpec(
            num_scalar_prefetch=0,
            grid=(N,),
            in_specs=[
                pl.BlockSpec((1, C, HW), lambda n: (n, 0, 0)),
                pl.BlockSpec((Cb + Co, C), lambda n: (0, 0)),
                pl.BlockSpec((Cb, 1), lambda n: (0, 0)),
                pl.BlockSpec((Cb, 9 * Cb), lambda n: (0, 0)),
                pl.BlockSpec((Cb, 1), lambda n: (0, 0)),
                pl.BlockSpec((Co, Cb), lambda n: (0, 0)),
                pl.BlockSpec((Co, 1), lambda n: (0, 0)),
                pl.BlockSpec((3, HW), lambda n: (0, 0)),
                pl.BlockSpec((HW, HoWo), lambda n: (0, 0)),
            ],
            out_specs=pl.BlockSpec((1, Co, HoWo), lambda n: (n, 0, 0)),
            scratch_shapes=[pltpu.VMEM((Cb, pad_tot), jnp.float32)],
        ),
        compiler_params=pltpu.CompilerParams(
            dimension_semantics=("parallel",),      # batch axis -> v7x 2-TC split
            vmem_limit_bytes=16 * 1024 * 1024,      # explicit budget (<<64MiB v7x)
        ),
        cost_estimate=pl.CostEstimate(flops=int(flops), transcendentals=0,
                                      bytes_accessed=int(bytes_accessed)),
    )(xf, w14, b1c, w2f, b2c, w3m, b34c, masks, sel)

    return out_flat.reshape(N, Co, Ho, Wo)


# ----------------------------------------------------------------------------
# Parameter init (deterministic, mimics PyTorch Conv2d default uniform init)
# Weights are stored in OIHW like nn.Conv2d.
# ----------------------------------------------------------------------------
def init_conv(key, cout, cin, kh, kw):
    kwgt, kb = jax.random.split(key)
    fan_in = cin * kh * kw
    bound = 1.0 / math.sqrt(fan_in)
    w = jax.random.uniform(kwgt, (cout, cin, kh, kw), jnp.float32, -bound, bound)
    b = jax.random.uniform(kb, (cout,), jnp.float32, -bound, bound)
    return w, b


def init_downsample(key, channels, bottleneck_channels, output_channels):
    k1, k2, k3, k4 = jax.random.split(key, 4)
    w1, b1 = init_conv(k1, bottleneck_channels, channels, 1, 1)
    w2, b2 = init_conv(k2, bottleneck_channels, bottleneck_channels, 3, 3)
    w3, b3 = init_conv(k3, output_channels, bottleneck_channels, 1, 1)
    w4, b4 = init_conv(k4, output_channels, channels, 1, 1)
    return (w1, b1, w2, b2, w3, b3, w4, b4)


# ----------------------------------------------------------------------------
# Pure-JAX reference (lax.conv) for correctness check
# ----------------------------------------------------------------------------
def reference_forward(x, params):
    w1, b1, w2, b2, w3, b3, w4, b4 = params
    dn = ("NCHW", "OIHW", "NCHW")

    def conv(inp, w, b, stride, pad):
        y = lax.conv_general_dilated(inp, w, (stride, stride), pad,
                                     dimension_numbers=dn,
                                     precision=lax.Precision.HIGHEST)
        return y + b.reshape(1, -1, 1, 1)

    y = jnp.maximum(conv(x, w1, b1, 1, "VALID"), 0.0)
    y = jnp.maximum(conv(y, w2, b2, 1, ((1, 1), (1, 1))), 0.0)
    p0 = conv(y, w3, b3, 2, "VALID")
    p1 = conv(x, w4, b4, 2, "VALID")
    return jnp.maximum(p0 + p1, 0.0)


if __name__ == "__main__":
    key = jax.random.PRNGKey(0)
    kx, kp = jax.random.split(key)

    N, C, H, W = 2, 4, 16, 16
    bottleneck_channels, output_channels = 8, 8

    x = jax.random.normal(kx, (N, C, H, W), jnp.float32)      # NCHW like PyTorch
    params = init_downsample(kp, C, bottleneck_channels, output_channels)

    out = jax.block_until_ready(downsample_forward(x, params))
    ref = jax.block_until_ready(reference_forward(x, params))

    assert out.shape == (N, output_channels, H // 2, W // 2), out.shape
    assert jnp.allclose(out, ref, atol=1e-4, rtol=1e-4), \
        float(jnp.max(jnp.abs(out - ref)))

    print("KERNEL_OK")
</pallas_src>

<mosaic_0001>
module attributes {stable_mosaic.version = 11 : i64} {
  func.func @kernel(%arg0: i32, %arg1: memref<1x4x256xf32, #tpu.memory_space<vmem>>, %arg2: memref<16x4xf32, #tpu.memory_space<vmem>>, %arg3: memref<8x1xf32, #tpu.memory_space<vmem>>, %arg4: memref<8x72xf32, #tpu.memory_space<vmem>>, %arg5: memref<8x1xf32, #tpu.memory_space<vmem>>, %arg6: memref<8x8xf32, #tpu.memory_space<vmem>>, %arg7: memref<8x1xf32, #tpu.memory_space<vmem>>, %arg8: memref<3x256xf32, #tpu.memory_space<vmem>>, %arg9: memref<256x64xbf16, #tpu.memory_space<vmem>>, %arg10: memref<1x8x64xf32, #tpu.memory_space<vmem>>, %arg11: memref<8x512xf32, #tpu.memory_space<vmem>>) attributes {dimension_semantics = [#tpu.dimension_semantics<parallel>], iteration_bounds = array<i64: 2>, scalar_prefetch = 0 : i64, scratch_operands = 1 : i64, tpu.core_type = #tpu.core_type<tc>, window_params = [{transform_indices = @transform_0, window_bounds = array<i64: 1, 4, 256>}, {pipeline_mode = #tpu.pipeline_mode<synchronous>, transform_indices = @transform_1, window_bounds = array<i64: 16, 4>}, {pipeline_mode = #tpu.pipeline_mode<synchronous>, transform_indices = @transform_2, window_bounds = array<i64: 8, 1>}, {pipeline_mode = #tpu.pipeline_mode<synchronous>, transform_indices = @transform_3, window_bounds = array<i64: 8, 72>}, {pipeline_mode = #tpu.pipeline_mode<synchronous>, transform_indices = @transform_4, window_bounds = array<i64: 8, 1>}, {pipeline_mode = #tpu.pipeline_mode<synchronous>, transform_indices = @transform_5, window_bounds = array<i64: 8, 8>}, {pipeline_mode = #tpu.pipeline_mode<synchronous>, transform_indices = @transform_6, window_bounds = array<i64: 8, 1>}, {pipeline_mode = #tpu.pipeline_mode<synchronous>, transform_indices = @transform_7, window_bounds = array<i64: 3, 256>}, {pipeline_mode = #tpu.pipeline_mode<synchronous>, transform_indices = @transform_8, window_bounds = array<i64: 256, 64>}, {transform_indices = @transform_9, window_bounds = array<i64: 1, 8, 64>}]} {
    %c0 = arith.constant 0 : index
    %c0_0 = arith.constant 0 : index
    %c0_1 = arith.constant 0 : index
    %0 = vector.load %arg1[%c0, %c0_0, %c0_1] : memref<1x4x256xf32, #tpu.memory_space<vmem>>, vector<1x4x256xf32>
    %1 = vector.shape_cast %0 : vector<1x4x256xf32> to vector<4x256xf32>
    %c0_2 = arith.constant 0 : index
    %c0_3 = arith.constant 0 : index
    %2 = vector.load %arg2[%c0_2, %c0_3] : memref<16x4xf32, #tpu.memory_space<vmem>>, vector<16x4xf32>
    %cst = arith.constant dense<0.000000e+00> : vector<16x256xf32>
    %3 = tpu.matmul %2, %1, %cst {dimension_numbers = #tpu.dot_dimension_numbers<[1], [0], [0], [1], [0, 0, 1, 1], [], []>} : vector<16x4xf32>, vector<4x256xf32>, vector<16x256xf32> -> vector<16x256xf32>
    %4 = vector.extract_strided_slice %3 {offsets = [0, 0], sizes = [8, 256], strides = [1, 1]} : vector<16x256xf32> to vector<8x256xf32>
    %c0_4 = arith.constant 0 : index
    %c0_5 = arith.constant 0 : index
    %5 = vector.load %arg3[%c0_4, %c0_5] : memref<8x1xf32, #tpu.memory_space<vmem>>, vector<8x1xf32>
    %6 = vector.broadcast %5 : vector<8x1xf32> to vector<8x256xf32>
    %7 = arith.addf %4, %6 : vector<8x256xf32>
    %cst_6 = arith.constant 0.000000e+00 : f32
    %8 = vector.broadcast %cst_6 : f32 to vector<8x256xf32>
    %9 = arith.maximumf %7, %8 : vector<8x256xf32>
    %10 = vector.extract_strided_slice %3 {offsets = [8, 0], sizes = [8, 256], strides = [1, 1]} : vector<16x256xf32> to vector<8x256xf32>
    %cst_7 = arith.constant 0.000000e+00 : f32
    %11 = vector.broadcast %cst_7 : f32 to vector<8x128xf32>
    %c0_8 = arith.constant 0 : index
    %c0_9 = arith.constant 0 : index
    %12 = vector.load %arg11[%c0_8, %c0_9] : memref<8x512xf32, #tpu.memory_space<vmem>>, vector<8x128xf32>
    tpu.vector_store %arg11[%c0_8, %c0_9], %11 {strides = array<i32>} : memref<8x512xf32, #tpu.memory_space<vmem>>, vector<8x128xf32>,
    %c0_10 = arith.constant 0 : index
    %c384 = arith.constant 384 : index
    %13 = vector.load %arg11[%c0_10, %c384] : memref<8x512xf32, #tpu.memory_space<vmem>>, vector<8x128xf32>
    tpu.vector_store %arg11[%c0_10, %c384], %11 {strides = array<i32>} : memref<8x512xf32, #tpu.memory_space<vmem>>, vector<8x128xf32>,
    %c0_11 = arith.constant 0 : index
    %c128 = arith.constant 128 : index
    %14 = vector.load %arg11[%c0_11, %c128] : memref<8x512xf32, #tpu.memory_space<vmem>>, vector<8x256xf32>
    tpu.vector_store %arg11[%c0_11, %c128], %9 {strides = array<i32>} : memref<8x512xf32, #tpu.memory_space<vmem>>, vector<8x256xf32>,
    %c0_12 = arith.constant 0 : index
    %c0_13 = arith.constant 0 : index
    %15 = vector.load %arg11[%c0_12, %c0_13] : memref<8x512xf32, #tpu.memory_space<vmem>>, vector<8x512xf32>
    %16 = vector.extract_strided_slice %15 {offsets = [0, 111], sizes = [8, 256], strides = [1, 1]} : vector<8x512xf32> to vector<8x256xf32>
    %c0_14 = arith.constant 0 : index
    %c0_15 = arith.constant 0 : index
    %17 = vector.load %arg8[%c0_14, %c0_15] : memref<3x256xf32, #tpu.memory_space<vmem>>, vector<1x256xf32>
    %18 = vector.broadcast %17 : vector<1x256xf32> to vector<8x256xf32>
    %19 = arith.mulf %16, %18 : vector<8x256xf32>
    %20 = vector.extract_strided_slice %15 {offsets = [0, 112], sizes = [8, 256], strides = [1, 1]} : vector<8x512xf32> to vector<8x256xf32>
    %21 = vector.extract_strided_slice %15 {offsets = [0, 113], sizes = [8, 256], strides = [1, 1]} : vector<8x512xf32> to vector<8x256xf32>
    %c2 = arith.constant 2 : index
    %c0_16 = arith.constant 0 : index
    %22 = vector.load %arg8[%c2, %c0_16] : memref<3x256xf32, #tpu.memory_space<vmem>>, vector<1x256xf32>
    %23 = vector.broadcast %22 : vector<1x256xf32> to vector<8x256xf32>
    %24 = arith.mulf %21, %23 : vector<8x256xf32>
    %25 = vector.extract_strided_slice %15 {offsets = [0, 127], sizes = [8, 256], strides = [1, 1]} : vector<8x512xf32> to vector<8x256xf32>
    %c0_17 = arith.constant 0 : index
    %c0_18 = arith.constant 0 : index
    %26 = vector.load %arg8[%c0_17, %c0_18] : memref<3x256xf32, #tpu.memory_space<vmem>>, vector<1x256xf32>
    %27 = vector.broadcast %26 : vector<1x256xf32> to vector<8x256xf32>
    %28 = arith.mulf %25, %27 : vector<8x256xf32>
    %29 = vector.extract_strided_slice %15 {offsets = [0, 128], sizes = [8, 256], strides = [1, 1]} : vector<8x512xf32> to vector<8x256xf32>
    %30 = vector.extract_strided_slice %15 {offsets = [0, 129], sizes = [8, 256], strides = [1, 1]} : vector<8x512xf32> to vector<8x256xf32>
    %c2_19 = arith.constant 2 : index
    %c0_20 = arith.constant 0 : index
    %31 = vector.load %arg8[%c2_19, %c0_20] : memref<3x256xf32, #tpu.memory_space<vmem>>, vector<1x256xf32>
    %32 = vector.broadcast %31 : vector<1x256xf32> to vector<8x256xf32>
    %33 = arith.mulf %30, %32 : vector<8x256xf32>
    %34 = vector.extract_strided_slice %15 {offsets = [0, 143], sizes = [8, 256], strides = [1, 1]} : vector<8x512xf32> to vector<8x256xf32>
    %c0_21 = arith.constant 0 : index
    %c0_22 = arith.constant 0 : index
    %35 = vector.load %arg8[%c0_21, %c0_22] : memref<3x256xf32, #tpu.memory_space<vmem>>, vector<1x256xf32>
    %36 = vector.broadcast %35 : vector<1x256xf32> to vector<8x256xf32>
    %37 = arith.mulf %34, %36 : vector<8x256xf32>
    %38 = vector.extract_strided_slice %15 {offsets = [0, 144], sizes = [8, 256], strides = [1, 1]} : vector<8x512xf32> to vector<8x256xf32>
    %39 = vector.extract_strided_slice %15 {offsets = [0, 145], sizes = [8, 256], strides = [1, 1]} : vector<8x512xf32> to vector<8x256xf32>
    %c2_23 = arith.constant 2 : index
    %c0_24 = arith.constant 0 : index
    %40 = vector.load %arg8[%c2_23, %c0_24] : memref<3x256xf32, #tpu.memory_space<vmem>>, vector<1x256xf32>
    %41 = vector.broadcast %40 : vector<1x256xf32> to vector<8x256xf32>
    %42 = arith.mulf %39, %41 : vector<8x256xf32>
    %43 = tpu.concatenate %19, %20, %24, %28, %29, %33, %37, %38, %42 in 0 : vector<8x256xf32>, vector<8x256xf32>, vector<8x256xf32>, vector<8x256xf32>, vector<8x256xf32>, vector<8x256xf32>, vector<8x256xf32>, vector<8x256xf32>, vector<8x256xf32> -> vector<72x256xf32>
    %c0_25 = arith.constant 0 : index
    %c0_26 = arith.constant 0 : index
    %44 = vector.load %arg4[%c0_25, %c0_26] : memref<8x72xf32, #tpu.memory_space<vmem>>, vector<8x72xf32>
    %cst_27 = arith.constant dense<0.000000e+00> : vector<8x256xf32>
    %45 = tpu.matmul %44, %43, %cst_27 {dimension_numbers = #tpu.dot_dimension_numbers<[1], [0], [0], [1], [0, 0, 1, 1], [], []>} : vector<8x72xf32>, vector<72x256xf32>, vector<8x256xf32> -> vector<8x256xf32>
    %c0_28 = arith.constant 0 : index
    %c0_29 = arith.constant 0 : index
    %46 = vector.load %arg5[%c0_28, %c0_29] : memref<8x1xf32, #tpu.memory_space<vmem>>, vector<8x1xf32>
    %47 = vector.broadcast %46 : vector<8x1xf32> to vector<8x256xf32>
    %48 = arith.addf %45, %47 : vector<8x256xf32>
    %cst_30 = arith.constant 0.000000e+00 : f32
    %49 = vector.broadcast %cst_30 : f32 to vector<8x256xf32>
    %50 = arith.maximumf %48, %49 : vector<8x256xf32>
    %c0_31 = arith.constant 0 : index
    %c0_32 = arith.constant 0 : index
    %51 = vector.load %arg6[%c0_31, %c0_32] : memref<8x8xf32, #tpu.memory_space<vmem>>, vector<8x8xf32>
    %cst_33 = arith.constant dense<0.000000e+00> : vector<8x256xf32>
    %52 = tpu.matmul %51, %50, %cst_33 {dimension_numbers = #tpu.dot_dimension_numbers<[1], [0], [0], [1], [0, 0, 1, 1], [], []>} : vector<8x8xf32>, vector<8x256xf32>, vector<8x256xf32> -> vector<8x256xf32>
    %53 = arith.addf %52, %10 : vector<8x256xf32>
    %c0_34 = arith.constant 0 : index
    %c0_35 = arith.constant 0 : index
    %54 = vector.load %arg7[%c0_34, %c0_35] : memref<8x1xf32, #tpu.memory_space<vmem>>, vector<8x1xf32>
    %55 = vector.broadcast %54 : vector<8x1xf32> to vector<8x256xf32>
    %56 = arith.addf %53, %55 : vector<8x256xf32>
    %c0_36 = arith.constant 0 : index
    %c0_37 = arith.constant 0 : index
    %57 = vector.load %arg9[%c0_36, %c0_37] : memref<256x64xbf16, #tpu.memory_space<vmem>>, vector<256x64xbf16>
    %58 = arith.extf %57 : vector<256x64xbf16> to vector<256x64xf32>
    %cst_38 = arith.constant dense<0.000000e+00> : vector<8x64xf32>
    %59 = tpu.matmul %56, %58, %cst_38 {dimension_numbers = #tpu.dot_dimension_numbers<[1], [0], [0], [1], [0, 0, 1, 1], [], []>} : vector<8x256xf32>, vector<256x64xf32>, vector<8x64xf32> -> vector<8x64xf32>
    %cst_39 = arith.constant 0.000000e+00 : f32
    %60 = vector.broadcast %cst_39 : f32 to vector<8x64xf32>
    %61 = arith.maximumf %59, %60 : vector<8x64xf32>
    %c0_40 = arith.constant 0 : index
    %c0_41 = arith.constant 0 : index
    %c0_42 = arith.constant 0 : index
    %62 = vector.load %arg10[%c0_40, %c0_41, %c0_42] : memref<1x8x64xf32, #tpu.memory_space<vmem>>, vector<1x8x64xf32>
    %63 = vector.shape_cast %62 : vector<1x8x64xf32> to vector<8x64xf32>
    %64 = vector.shape_cast %61 : vector<8x64xf32> to vector<1x8x64xf32>
    tpu.vector_store %arg10[%c0_40, %c0_41, %c0_42], %64 {strides = array<i32>} : memref<1x8x64xf32, #tpu.memory_space<vmem>>, vector<1x8x64xf32>,
    return
  }
  func.func @transform_0(%arg0: i32) -> (i32, i32, i32) {
    %c0_i32 = arith.constant 0 : i32
    %c0_i32_0 = arith.constant 0 : i32
    %c0_i32_1 = arith.constant 0 : i32
    return %arg0, %c0_i32, %c0_i32_0 : i32, i32, i32
  }
  func.func @transform_1(%arg0: i32) -> (i32, i32) {
    %c0_i32 = arith.constant 0 : i32
    %c0_i32_0 = arith.constant 0 : i32
    %c0_i32_1 = arith.constant 0 : i32
    return %c0_i32, %c0_i32_0 : i32, i32
  }
  func.func @transform_2(%arg0: i32) -> (i32, i32) {
    %c0_i32 = arith.constant 0 : i32
    %c0_i32_0 = arith.constant 0 : i32
    %c0_i32_1 = arith.constant 0 : i32
    return %c0_i32, %c0_i32_0 : i32, i32
  }
  func.func @transform_3(%arg0: i32) -> (i32, i32) {
    %c0_i32 = arith.constant 0 : i32
    %c0_i32_0 = arith.constant 0 : i32
    %c0_i32_1 = arith.constant 0 : i32
    return %c0_i32, %c0_i32_0 : i32, i32
  }
  func.func @transform_4(%arg0: i32) -> (i32, i32) {
    %c0_i32 = arith.constant 0 : i32
    %c0_i32_0 = arith.constant 0 : i32
    %c0_i32_1 = arith.constant 0 : i32
    return %c0_i32, %c0_i32_0 : i32, i32
  }
  func.func @transform_5(%arg0: i32) -> (i32, i32) {
    %c0_i32 = arith.constant 0 : i32
    %c0_i32_0 = arith.constant 0 : i32
    %c0_i32_1 = arith.constant 0 : i32
    return %c0_i32, %c0_i32_0 : i32, i32
  }
  func.func @transform_6(%arg0: i32) -> (i32, i32) {
    %c0_i32 = arith.constant 0 : i32
    %c0_i32_0 = arith.constant 0 : i32
    %c0_i32_1 = arith.constant 0 : i32
    return %c0_i32, %c0_i32_0 : i32, i32
  }
  func.func @transform_7(%arg0: i32) -> (i32, i32) {
    %c0_i32 = arith.constant 0 : i32
    %c0_i32_0 = arith.constant 0 : i32
    %c0_i32_1 = arith.constant 0 : i32
    return %c0_i32, %c0_i32_0 : i32, i32
  }
  func.func @transform_8(%arg0: i32) -> (i32, i32) {
    %c0_i32 = arith.constant 0 : i32
    %c0_i32_0 = arith.constant 0 : i32
    %c0_i32_1 = arith.constant 0 : i32
    return %c0_i32, %c0_i32_0 : i32, i32
  }
  func.func @transform_9(%arg0: i32) -> (i32, i32, i32) {
    %c0_i32 = arith.constant 0 : i32
    %c0_i32_0 = arith.constant 0 : i32
    %c0_i32_1 = arith.constant 0 : i32
    return %arg0, %c0_i32, %c0_i32_0 : i32, i32, i32
  }
}

</mosaic_0001>

<bundles_post_ra>
// kernel: tpu_custom_call.1
= control target key start
LH: loop header
LB: loop body
LE: loop exit
PB: predicated region body
PF: predicated region fallthrough
CT: control target
= control target key end

     0   :  { %14 = vsyncpa [#allocation4], 0  ;;  %s1612_s0 = inlined_call_operand.vmem [shape: f32[2,4,256], index: 0, kind: input, shape index: {}]   ;;  %s1613_s1 = inlined_call_operand.vmem [shape: f32[16,4], index: 1, kind: input, shape index: {}]   ;;  %s1614_s2 = inlined_call_operand.vmem [shape: f32[8,1], index: 2, kind: input, shape index: {}]   ;;  %s1615_s3 = inlined_call_operand.vmem [shape: f32[8,72], index: 3, kind: input, shape index: {}]   ;;  %s1616_s4 = inlined_call_operand.vmem [shape: f32[8,1], index: 4, kind: input, shape index: {}]   ;;  %s1617_s5 = inlined_call_operand.vmem [shape: f32[8,8], index: 5, kind: input, shape index: {}]   ;;  %s1618_s6 = inlined_call_operand.vmem [shape: f32[8,1], index: 6, kind: input, shape index: {}]   ;;  %s1619_s7 = inlined_call_operand.vmem [shape: f32[3,256], index: 7, kind: input, shape index: {}]   ;;  %s1620_s8 = inlined_call_operand.vmem [shape: bf16[256,64], index: 8, kind: input, shape index: {}]   ;;  %s1621_s9 = inlined_call_operand.hbm [shape: f32[2,8,64], index: 9, kind: output, shape index: {}]  }
   0x1   :  { %16 = vsyncpa [#allocation4 + $0x1], 0  ;;  %s1352_s30 = smov 0   ;;  %s1354_s10 = smov 0  }
   0x2   :  { %s1356_s11 = smov 0   ;;  %s1358_s12 = smov 0  }
   0x3 LB: > { %s1373_s13 = sadd.s32 4294967295, %s1286_s12   ;;  %s962_s14 = sadd.s32 4294967294, %s1286_s12   ;;  %s1286_s12 = sphi %s1358_s12, %s1627_s12   ;;  %s1282_s11 = sphi %s1356_s11, %s1626_s11   ;;  %s1278_s10 = sphi %s1354_s10, %s1625_s10   ;;  %s1274_s30 = sphi %s1352_s30, %s1624_s30  }
   0x4   : > { %s1377_s15 = sadd.s32 1, %s1286_s12   ;;  %s223_s16 = sadd.s32 1, %s1282_s11 }
   0x5   : > { %s220_s17 = ssub.s32 %s1286_s12, %s1377_s15  ;;  %p233_p0 = scmp.ne.s32.totalorder %s1282_s11, %s1278_s10 }
   0x6   : > { %p221_p1 = scmp.eq.s32.totalorder %s220_s17, 0  ;;  %p234_p2 = scmp.eq.s32.totalorder %s1373_s13, 1 }
   0x7   : > { %p239_p3 = scmp.ne.s32.totalorder %s1278_s10, %s1274_s30  ;;  %p240_p4 = scmp.eq.s32.totalorder %s962_s14, 1 }
   0x8   : > { %s1388_s18 = scalar_select %p221_p1, %s1282_s11, %s223_s16  }
   0x9   : > { %p1390_p5 = por %p234_p2, %p233_p0  ;;  %p1394_p6 = por %p240_p4, %p239_p3 }
   0xa   : > { %p965_p7 = scmp.ge.s32.totalorder %s1286_s12, 1  ;;  %p290_p8 = scmp.lt.s32.totalorder %s1286_s12, 3 }
   0xc   : > { %p291_p9 = pnand %p965_p7, %p290_p8 }
   0xd   : > { %p326_p10 = scmp.lt.s32.totalorder (!%p291_p9), %s1373_s13, 1  ;;  %s1289_s27 = smov (!%p291_p9), 17  }
   0xe   : > { %294 = sbr.rel (%p291_p9) target bundleno = 856 (0x358), region = 56  ;;  %s1290_s14 = smov (!%p291_p9), 15  }
   0xf   : > { %s1291_s22 = smov (!%p291_p9), 1   ;;  %s1292_s25 = smov (!%p291_p9), 127  }
  0x10   : > { %s1293_s26 = smov (!%p291_p9), 113   ;;  %s1298_s16 = smov (!%p291_p9), 94  }
  0x11   : > { %s1299_s17 = smov (!%p291_p9), 110  }
  0x13   : > { %v396_v0 = vld [vmem:[%s1614_s2] sm:$0xff]  ;;  %v1288_v2 = vmov 0   ;;  %s327_s28 = scalar_select %p326_p10, %s1373_s13, 1  ;;  %vm345_vm0 = vcmask 1043456   ;;  %vm338_vm1 = vcmask 31744   ;;  %v1296_v16 = vmov 0.0  }
  0x14   : > { %v975_v1 = vld [vmem:[%s1619_s7 + $0x2] ss:$4 sm:$0x3]  ;;  %1117 = vset.pattern.permute.xlu0 %v1288_v2  ;;  %1223 = vset.pattern.permute.xlu1 %v1288_v2  ;;  %v414_v4 = vld [vmem:[%s1619_s7] ss:$4 sm:$0x3] }
  0x15   : > { %v434_v3 = vperm.slane %v975_v1, 1  ;;  %399 = vperm.xlu0 %1117, %v396_v0   ;;  %v1412_v5 = vperm.slane %v414_v4, 1  ;;  %s984_s29 = sshll.u32 %s327_s28, 3  ;;  %v433_v6 = vperm.slane %v975_v1, 0  ;;  %v416_v8 = vperm.slane %v414_v4, 0  ;;  %v332_v9 = vld [vmem:[%s1613_s1] sm:$0xff] }
  0x16   : > { %s330_s21 = scalar_lea.vmem %s1612_s0, %s984_s29  ;;  %s1294_s28 = smov 111   ;;  %vm487_vm2 = vcmask 138240   ;;  %vm475_vm3 = vcmask 121856   ;;  %vm463_vm4 = vcmask 7168   ;;  %vm439_vm5 = vcmask 924672  }
  0x17   : > { %485 = vrot.lane.b32.xlu1 %v434_v3, %s1289_s27  ;;  %473 = vrot.lane.b32.xlu2 %v1412_v5, %s1290_s14  ;;  %v331_v7 = vld [vmem:[%s330_s21] sm:$0xff]  ;;  %s1295_s29 = smov 96   ;;  %vm451_vm6 = vcmask 1039360   ;;  %s1300_s21 = smov 112   ;;  %vm566_vm7 = vcmask 777216   ;;  %vm544_vm8 = vcmask 900096  }
  0x18   : > { %335 = vst [vmem:[#allocation1] ss:$2 sm:$0xff] %v331_v7  ;;  %vm422_vm9 = vcmask 908288   ;;  %vm578_vm10 = vcmask 769024   ;;  %vm527_vm11 = vcmask 916480   ;;  %vm556_vm12 = vcmask 785408  }
  0x19   : > { %vm515_vm13 = vcmask 1031168   ;;  %vm681_vm14 = vcmask 588800   ;;  %vm728_vm15 = vcmask 64512  }
  0x1d   : > { %483 = vrot.lane.b32.xlu0 %v433_v6, %s1289_s27 }
  0x1f   : > { %471 = vrot.lane.b32.xlu1 %v416_v8, %s1290_s14  ;;  %459 = vrot.lane.b32.xlu2 %v433_v6, %s1291_s22  ;;  %v336_v10 = vld.sshfl [vmem:[#allocation1] sm:$0xff pattern:$0x75316420]  ;;  %v337_v11 = vld.sshfl [vmem:[#allocation1 + $0x8] sm:$0xff pattern:$0x75316420] }
  0x20   : > { %969 = vmatpush.msk.msra.mxu2 %vm345_vm0, %v336_v10  ;;  %972 = vmatpush.msk.msra.mxu3 %vm345_vm0, %v337_v11  ;;  %s1297_s14 = smov 95   ;;  %vm885_vm0 = vcmask 523264  }
  0x21   : > { %970 = vmatmul.msk.f32.vlgmr.msra.gmra.mxu2 %vm338_vm1, %v332_v9  ;;  %973 = vmatmul.msk.f32.vlgmr.msra.gmra.mxu3 %vm338_vm1, %v332_v9 }
  0x25   : > { %461 = vrot.lane.b32.xlu0 %v434_v3, %s1291_s22  ;;  %s1301_s22 = smov 126  }
  0x27   : > { %447 = vrot.lane.b32.xlu1 %v416_v8, %s1292_s25  ;;  %449 = vrot.lane.b32.xlu2 %v1412_v5, %s1292_s25 }
  0x2d   : > { %435 = vrot.lane.b32.xlu0 %v433_v6, %s1293_s26 }
  0x2f   : > { %437 = vrot.lane.b32.xlu1 %v434_v3, %s1293_s26  ;;  %564 = vrot.lane.b32.xlu2 %v1296_v16, %s1297_s14 }
  0x35   : > { %418 = vrot.lane.b32.xlu0 %v416_v8, %s1294_s28 }
  0x71   : > { %v474_v12 = vpop.permute.xlu2 %473 }
  0x72   : > { %v482_v13 = vmul.f32 0.0, %v474_v12 }
  0x74   : > { %554 = vrot.lane.b32.xlu1 %v482_v13, %s1295_s29 }
  0x79   : > { %v460_v30 = vpop.permute.xlu2 %459 }
  0x81   : > { %v450_v44 = vpop.permute.xlu2 %449 }
  0x87   : > { %v400_v14 = vpop.permute.xlu0 %399 }
  0x89   : > { %v486_v15 = vpop.permute.xlu1 %485  ;;  %v565_v57 = vpop.permute.xlu2 %564 }
  0x8a   : > { %v494_v17 = vmul.f32 0.0, %v486_v15 }
  0x8c   : > { %576 = vrot.lane.b32.xlu0 %v494_v17, %s1298_s16 }
  0x8f   : > { %v484_v18 = vpop.permute.xlu0 %483 }
  0x90   : > { %v488_v27 = vsel %vm487_vm2, %v484_v18, %v486_v15 }
  0x91   : > { %v472_v21 = vpop.permute.xlu1 %471 }
  0x92   : > { %v476_v31 = vsel %vm475_vm3, %v472_v21, %v474_v12 }
  0x97   : > { %v462_v19 = vpop.permute.xlu0 %461 }
  0x98   : > { %v470_v20 = vmul.f32 0.0, %v462_v19  ;;  %v464_v38 = vsel %vm463_vm4, %v460_v30, %v462_v19 }
  0x99   : > { %v448_v26 = vpop.permute.xlu1 %447 }
  0x9a   : > { %542 = vrot.lane.b32.xlu0 %v470_v20, %s1299_s17  ;;  %v452_v47 = vsel %vm451_vm6, %v448_v26, %v450_v44  ;;  %v456_v51 = vmul.f32 0.0, %v448_v26 }
  0x9f   : > { %v436_v41 = vpop.permute.xlu0 %435 }
  0xa0   : > { %v444_v49 = vmul.f32 0.0, %v436_v41 }
  0xa1   : > { %v438_v40 = vpop.permute.xlu1 %437 }
  0xa2   : > { %v440_v45 = vsel %vm439_vm5, %v436_v41, %v438_v40 }
  0xa4   : > { %v367_v22 = vpop.f32.mrf.mxu2  ;;  %v390_v23 = vpop.f32.mrf.mxu3 }
  0xa5   : > { %v402_v24 = vadd.f32 %v400_v14, %v367_v22  ;;  %v403_v25 = vadd.f32 %v400_v14, %v390_v23 }
  0xa7   : > { %v1432_v28 = vmax.f32 %v402_v24, 0.0  ;;  %v1434_v29 = vmax.f32 %v403_v25, 0.0  ;;  %v1459_v58 = vpop.permute.xlu0 %418 }
  0xa9   : > { %v1118_v32 = vpack.i.bf16 %v1434_v29, %v1432_v28  ;;  %v492_v33 = vmul.f32 %v484_v18, %v1432_v28  ;;  %v493_v34 = vmul.f32 %v488_v27, %v1434_v29  ;;  %v480_v35 = vmul.f32 %v472_v21, %v1432_v28 }
  0xaa   : > { %v481_v36 = vmul.f32 %v476_v31, %v1434_v29  ;;  %v468_v42 = vmul.f32 %v460_v30, %v1432_v28  ;;  %v469_v43 = vmul.f32 %v464_v38, %v1434_v29  ;;  %v458_v48 = vmul.f32 %v450_v44, %v1434_v29 }
  0xab   : > { %1119 = vrot.lane.b32.xlu1 %v1118_v32, %s1297_s14  ;;  %v1128_v37 = vpack.i.bf16 %v493_v34, %v492_v33  ;;  %v445_v50 = vmul.f32 %v440_v45, %v1432_v28  ;;  %v457_v52 = vmul.f32 %v452_v47, %v1432_v28  ;;  %v446_v55 = vmul.f32 %v438_v40, %v1434_v29 }
  0xac   : > { %v1133_v39 = vpack.i.bf16 %v481_v36, %v480_v35  ;;  %v1138_v46 = vpack.i.bf16 %v469_v43, %v468_v42  ;;  %v1153_v56 = vpack.i.bf16 %v1432_v28, %v1296_v16 }
  0xad   : > { %1129 = vrot.lane.b32.xlu2 %v1128_v37, %s1298_s16  ;;  %v1148_v53 = vpack.i.bf16 %v445_v50, %v444_v49  ;;  %v1143_v54 = vpack.i.bf16 %v457_v52, %v456_v51  ;;  %v582_v52 = vld [vmem:[%s1616_s4] sm:$0xff]  ;;  %s981_s16 = sshll.u32 %s1373_s13, 3 }
  0xae   : > { %1134 = vrot.lane.b32.xlu0 %v1133_v39, %s1295_s29  ;;  %s323_s29 = sand.u32 1, %s1278_s10  }
  0xaf   : > { %s966_s14 = sshll.u32 %s323_s29, 3  ;;  %s888_s26 = scalar_lea.sflag [#allocation4], %s323_s29 }
  0xb0   : > { %s325_s23 = scalar_lea.vmem [#allocation3], %s966_s14  ;;  %s1244_s14 = scalar_lea.hbm %s1621_s9, 16 }
  0xb1   : > { %s900_s24 = sshll.u32 %s325_s23, 4  ;;  %s901_s24 = int_to_ptr.vmem [resolvable:$true] %s900_s24 }
  0xb3   : > { %1124 = vrot.lane.b32.xlu1 %v1118_v32, %s1294_s28 }
  0xb5   : > { %1139 = vrot.lane.b32.xlu2 %v1138_v46, %s1299_s17 }
  0xb6   : > { %525 = vrot.lane.b32.xlu0 %v458_v48, %s1300_s21 }
  0xbb   : > { %1149 = vrot.lane.b32.xlu1 %v1148_v53, %s1301_s22 }
  0xbd   : > { %1144 = vrot.lane.b32.xlu2 %v1143_v54, %s1300_s21 }
  0xbe   : > { %502 = vrot.lane.b32.xlu0 %v1434_v29, %s1292_s25 }
  0xc3   : > { %420 = vrot.lane.b32.xlu1 %v1412_v5, %s1294_s28 }
  0xc5   : > { %513 = vrot.lane.b32.xlu2 %v446_v55, %s1301_s22  ;;  %s898_s22 = scalar_lea.hbm %s1621_s9, %s981_s16 }
  0xcd   : > { %1154 = vrot.lane.b32.xlu2 %v1153_v56, %s1292_s25  ;;  %s902_s25 = sshll.u32 %s898_s22, 4  ;;  %s903_s25 = int_to_ptr.hbm [resolvable:$true] %s902_s25 }
  0xe6   : > { %v555_v62 = vpop.permute.xlu1 %554 }
  0xfe   : > { %v577_v60 = vpop.permute.xlu0 %576 }
 0x107   : > { %v1130_v59 = vpop.permute.xlu2 %1129 }
 0x108   : > { %v1132_v23 = vunpack.i.h.bf16 %v1130_v59  ;;  %v1131_v24 = vunpack.i.l.bf16 %v1130_v59  ;;  %v427_v59 = vmul.f32 0.0, %v1459_v58 }
 0x10a   : > { %v579_v30 = vsel %vm578_vm10, %v1131_v24, %v1132_v23  ;;  %v580_v34 = vsel %vm578_vm10, %v1132_v23, %v577_v60 }
 0x10b   : > { %v1173_v32 = vpack.i.bf16 %v579_v30, %v1131_v24 }
 0x10c   : > { %v543_v0 = vpop.permute.xlu0 %542 }
 0x10f   : > { %v1461_v61 = vpop.permute.xlu2 %1139 }
 0x110   : > { %v1142_v9 = vunpack.i.h.bf16 %v1461_v61  ;;  %v1141_v10 = vunpack.i.l.bf16 %v1461_v61 }
 0x112   : > { %v545_v12 = vsel %vm544_vm8, %v1141_v10, %v1142_v9  ;;  %v546_v13 = vsel %vm544_vm8, %v1142_v9, %v543_v0 }
 0x113   : > { %v1193_v20 = vpack.i.bf16 %v546_v13, %v545_v12 }
 0x117   : > { %v1463_v63 = vpop.permute.xlu2 %1144 }
 0x118   : > { %v1147_v27 = vunpack.i.h.bf16 %v1463_v63  ;;  %v1146_v48 = vunpack.i.l.bf16 %v1463_v63 }
 0x11a   : > { %v528_v54 = vsel %vm527_vm11, %v1146_v48, %v1147_v27 }
 0x11d   : > { %v1120_v1 = vpop.permute.xlu1 %1119 }
 0x11e   : > { %v1122_v2 = vunpack.i.h.bf16 %v1120_v1  ;;  %v1121_v3 = vunpack.i.l.bf16 %v1120_v1  ;;  %v333_v1 = vld [vmem:[%s1613_s1 + $0x8] sm:$0xff] }
 0x11f   : > { %v514_v4 = vpop.permute.xlu2 %513  ;;  %971 = vmatmul.msk.f32.gmra.mxu2 %vm338_vm1, %v333_v1  ;;  %974 = vmatmul.msk.f32.gmra.mxu3 %vm338_vm1, %v333_v1  ;;  %v1054_v1 = vld [vmem:[%s1620_s8 + $0x30] sm:$0xff]  }
 0x120   : > { %v1135_v5 = vpop.permute.xlu0 %1134  ;;  %v567_v6 = vsel %vm566_vm7, %v1121_v3, %v1122_v2  ;;  %v568_v7 = vsel %vm566_vm7, %v1122_v2, %v565_v57  ;;  %v1178_v37 = vpack.i.bf16 %v1121_v3, %v580_v34 }
 0x121   : > { %v1158_v8 = vpack.i.bf16 %v568_v7, %v567_v6  ;;  %v1137_v35 = vunpack.i.h.bf16 %v1135_v5  ;;  %v1136_v36 = vunpack.i.l.bf16 %v1135_v5 }
 0x123   : > { %1159 = vrot.lane.b32.xlu0 %v1158_v8, %s1289_s27  ;;  %v557_v40 = vsel %vm556_vm12, %v1136_v36, %v1137_v35  ;;  %v558_v42 = vsel %vm556_vm12, %v1137_v35, %v555_v62 }
 0x124   : > { %v1183_v43 = vpack.i.bf16 %v557_v40, %v1136_v36  ;;  %v1188_v47 = vpack.i.bf16 %v1141_v10, %v558_v42 }
 0x125   : > { %v1125_v11 = vpop.permute.xlu1 %1124 }
 0x126   : > { %v1127_v14 = vunpack.i.h.bf16 %v1125_v11  ;;  %v1126_v15 = vunpack.i.l.bf16 %v1125_v11 }
 0x127   : > { %v1155_v16 = vpop.permute.xlu2 %1154 }
 0x128   : > { %v534_v17 = vsel %vm422_vm9, %v1126_v15, %v1127_v14  ;;  %v1157_v18 = vunpack.i.h.bf16 %v1155_v16  ;;  %v1156_v19 = vunpack.i.l.bf16 %v1155_v16  ;;  %v526_v22 = vpop.permute.xlu0 %525  ;;  %v1198_v56 = vpack.i.bf16 %v528_v54, %v1127_v14  ;;  %v581_v54 = vld [vmem:[%s1615_s3] sm:$0xff] }
 0x129   : > { %v1163_v21 = vpack.i.bf16 %v534_v17, %v1126_v15  ;;  %v529_v31 = vsel %vm527_vm11, %v1147_v27, %v526_v22 }
 0x12a   : > { %v504_v25 = vsel %vm451_vm6, %v1156_v19, %v1157_v18  ;;  %v1203_v33 = vpack.i.bf16 %v526_v22, %v529_v31 }
 0x12b   : > { %1194 = vrot.lane.b32.xlu0 %v1193_v20, %s1289_s27  ;;  %1164 = vrot.lane.b32.xlu1 %v1163_v21, %s1289_s27  ;;  %v1168_v26 = vpack.i.bf16 %v504_v25, %v514_v4 }
 0x12d   : > { %1169 = vrot.lane.b32.xlu2 %v1168_v26, %s1289_s27  ;;  %v1150_v39 = vpop.permute.xlu1 %1149 }
 0x12e   : > { %v1152_v45 = vunpack.i.h.bf16 %v1150_v39  ;;  %v1151_v46 = vunpack.i.l.bf16 %v1150_v39 }
 0x130   : > { %v503_v38 = vpop.permute.xlu0 %502  ;;  %v516_v49 = vsel %vm515_vm13, %v1151_v46, %v1152_v45  ;;  %v517_v50 = vsel %vm515_vm13, %v1152_v45, %v514_v4 }
 0x131   : > { %v505_v41 = vsel %vm451_vm6, %v1157_v18, %v503_v38  ;;  %v1213_v53 = vpack.i.bf16 %v517_v50, %v516_v49 }
 0x132   : > { %v1208_v44 = vpack.i.bf16 %v503_v38, %v505_v41 }
 0x133   : > { %1204 = vrot.lane.b32.xlu0 %v1203_v33, %s1289_s27  ;;  %1174 = vrot.lane.b32.xlu1 %v1173_v32, %s1289_s27 }
 0x135   : > { %1179 = vrot.lane.b32.xlu2 %v1178_v37, %s1289_s27  ;;  %v421_v51 = vpop.permute.xlu1 %420 }
 0x136   : > { %v423_v55 = vsel %vm422_vm9, %v1459_v58, %v421_v51  ;;  %v429_v61 = vmul.f32 %v421_v51, %v1434_v29 }
 0x137   : > { %v428_v57 = vmul.f32 %v423_v55, %v1432_v28 }
 0x139   : > { %v1218_v60 = vpack.i.bf16 %v428_v57, %v427_v59  ;;  %v772_v57 = vld [vmem:[%s1618_s6] sm:$0xff]  ;;  %v1055_v59 = vld [vmem:[%s1620_s8 + $0x38] sm:$0xff]  }
 0x13b   : > { %1209 = vrot.lane.b32.xlu0 %v1208_v44, %s1289_s27  ;;  %1184 = vrot.lane.b32.xlu1 %v1183_v43, %s1289_s27 }
 0x13d   : > { %1189 = vrot.lane.b32.xlu2 %v1188_v47, %s1289_s27 }
 0x143   : > { %585 = vperm.xlu0 %1117, %v582_v52   ;;  %1214 = vrot.lane.b32.xlu1 %v1213_v53, %s1289_s27 }
 0x145   : > { %1199 = vrot.lane.b32.xlu2 %v1198_v56, %s1289_s27 }
 0x14b   : > { %1219 = vrot.lane.b32.xlu1 %v1218_v60, %s1289_s27  ;;  %v1063_v60 = vld [vmem:[%s1620_s8 + $0x78] sm:$0xff]  }
 0x14d   : > { %595 = vrot.lane.b32.xlu2 %v429_v61, %s1289_s27  ;;  %v1016_v61 = vunpack.c.h.bf16 %v1055_v59  ;;  %s1238_s27 = sshra.s32 %s903_s25, 4  ;;  %s1239_s27 = int_to_ptr.hbm [resolvable:$true] %s1238_s27 }
 0x14e   : > { %s1240_s13 = scalar_lea.hbm %s1239_s27, 8  ;;  %p1245_p0 = scmp.lt.s32.totalorder %s1239_s27, %s1621_s9 }
 0x14f   : > { %844 = vmatpush.msra.mxu0 %v1016_v61  ;;  %p1241_p11 = scmp.ne.s32.totalorder %s1239_s27, %s1240_s13  ;;  %p1246_p1 = scmp.lt.s32.totalorder %s1244_s14, %s1240_s13 }
 0x151   : > { %p1242_p12 = pnand %p1241_p11, %p1390_p5  ;;  %p1247_p2 = por %p1246_p1, %p1245_p0 }
 0x153   : > { %775 = vperm.xlu1 %1223, %v772_v57   ;;  %p1243_p13 = pneg %p1242_p12 }
 0x155   : > { %p1248_p3 = pnand %p1247_p2, %p1243_p13 }
 0x187   : > { %v1496_v62 = vpop.permute.xlu2 %1169 }
 0x188   : > { %v1171_v37 = vunpack.i.l.bf16 %v1496_v62  ;;  %v1172_v45 = vunpack.i.h.bf16 %v1496_v62  ;;  %v1048_v62 = vunpack.c.h.bf16 %v1063_v60 }
 0x18a   : > { %864 = vmatpush.msra.mxu1 %v1048_v62 }
 0x18f   : > { %v1180_v0 = vpop.permute.xlu2 %1179 }
 0x190   : > { %v1181_v29 = vunpack.i.l.bf16 %v1180_v0  ;;  %v1182_v8 = vunpack.i.h.bf16 %v1180_v0  ;;  %v1047_v0 = vunpack.c.l.bf16 %v1063_v60 }
 0x192   : > { %865 = vmatpush.msra.mxu1 %v1047_v0 }
 0x195   : > { %v1160_v63 = vpop.permute.xlu0 %1159 }
 0x196   : > { %v1162_v4 = vunpack.i.h.bf16 %v1160_v63  ;;  %v1161_v5 = vunpack.i.l.bf16 %v1160_v63  ;;  %v1015_v63 = vunpack.c.l.bf16 %v1055_v59 }
 0x197   : > { %v1190_v2 = vpop.permute.xlu2 %1189 }
 0x198   : > { %v659_v12 = vsel %vm487_vm2, %v1182_v8, %v1161_v5  ;;  %v660_v13 = vsel %vm487_vm2, %v1161_v5, %v1162_v4  ;;  %v1191_v14 = vunpack.i.l.bf16 %v1190_v2  ;;  %v1192_v21 = vunpack.i.h.bf16 %v1190_v2  ;;  %845 = vmatpush.msra.mxu0 %v1015_v63  ;;  %v1052_v8 = vld [vmem:[%s1620_s8 + $0x20] sm:$0xff]  }
 0x199   : > { %v1011_v4 = vunpack.c.l.bf16 %v1054_v1 }
 0x19d   : > { %v1165_v28 = vpop.permute.xlu1 %1164  ;;  %v1195_v58 = vpop.permute.xlu0 %1194 }
 0x19e   : > { %v1197_v17 = vunpack.i.h.bf16 %v1195_v58  ;;  %v1196_v18 = vunpack.i.l.bf16 %v1195_v58  ;;  %v1167_v22 = vunpack.i.h.bf16 %v1165_v28  ;;  %v1166_v23 = vunpack.i.l.bf16 %v1165_v28  ;;  %v1062_v28 = vld [vmem:[%s1620_s8 + $0x70] sm:$0xff]  }
 0x19f   : > { %v1200_v15 = vpop.permute.xlu2 %1199  ;;  %v1012_v58 = vunpack.c.h.bf16 %v1054_v1  ;;  %v1044_v2 = vunpack.c.h.bf16 %v1062_v28  ;;  %v1043_v5 = vunpack.c.l.bf16 %v1062_v28 }
 0x1a0   : > { %v1201_v24 = vunpack.i.l.bf16 %v1200_v15  ;;  %v655_v31 = vsel %vm487_vm2, %v1192_v21, %v1196_v18  ;;  %v656_v32 = vsel %vm487_vm2, %v1196_v18, %v1197_v17  ;;  %v1202_v33 = vunpack.i.h.bf16 %v1200_v15  ;;  %v1059_v15 = vld [vmem:[%s1620_s8 + $0x58] sm:$0xff]  }
 0x1a1   : > { %v653_v35 = vsel %vm487_vm2, %v1166_v23, %v1167_v22  ;;  %846 = vmatpush.msra.mxu0 %v1012_v58  ;;  %866 = vmatpush.msra.mxu1 %v1044_v2  ;;  %v1058_v23 = vld [vmem:[%s1620_s8 + $0x50] sm:$0xff]  }
 0x1a2   : > { %v654_v36 = vsel %vm487_vm2, %v1167_v22, %v1201_v24  ;;  %v393_v21 = vpop.f32.mrf.mxu3  ;;  %v1050_v22 = vld [vmem:[%s1620_s8 + $0x10] sm:$0xff]  }
 0x1a3   : > { %847 = vmatpush.msra.mxu0 %v1011_v4  ;;  %867 = vmatpush.msra.mxu1 %v1043_v5 }
 0x1a5   : > { %v1175_v3 = vpop.permute.xlu1 %1174  ;;  %v1205_v11 = vpop.permute.xlu0 %1204 }
 0x1a6   : > { %v1177_v6 = vunpack.i.h.bf16 %v1175_v3  ;;  %v1176_v7 = vunpack.i.l.bf16 %v1175_v3  ;;  %v1207_v27 = vunpack.i.h.bf16 %v1205_v11  ;;  %v1206_v30 = vunpack.i.l.bf16 %v1205_v11  ;;  %v1061_v3 = vld [vmem:[%s1620_s8 + $0x68] sm:$0xff]  }
 0x1a7   : > { %v596_v53 = vpop.permute.xlu2 %595  ;;  %v1039_v11 = vunpack.c.l.bf16 %v1061_v3 }
 0x1a8   : > { %v661_v9 = vsel %vm487_vm2, %v1176_v7, %v1177_v6  ;;  %v662_v10 = vsel %vm487_vm2, %v1177_v6, %v1181_v29  ;;  %v651_v39 = vsel %vm487_vm2, %v1202_v33, %v1206_v30  ;;  %v652_v40 = vsel %vm487_vm2, %v1206_v30, %v1207_v27  ;;  %v1053_v29 = vld [vmem:[%s1620_s8 + $0x28] sm:$0xff]  }
 0x1a9   : > { %692 = vmatpush.msrb.mxu2 %v661_v9  ;;  %712 = vmatpush.msrb.mxu3 %v662_v10  ;;  %v1008_v6 = vunpack.c.h.bf16 %v1053_v29  ;;  %v1040_v7 = vunpack.c.h.bf16 %v1061_v3  ;;  %v1060_v9 = vld [vmem:[%s1620_s8 + $0x60] sm:$0xff]   ;;  %v1007_v10 = vunpack.c.l.bf16 %v1053_v29  ;;  %v1028_v27 = vunpack.c.h.bf16 %v1058_v23  ;;  %v1049_v30 = vld [vmem:[%s1620_s8 + $0x8] sm:$0xff]  }
 0x1aa   : > { %v1035_v17 = vunpack.c.l.bf16 %v1060_v9  ;;  %v1027_v33 = vunpack.c.l.bf16 %v1058_v23 }
 0x1ab   : > { %693 = vmatpush.msrb.mxu2 %v659_v12  ;;  %713 = vmatpush.msrb.mxu3 %v660_v13  ;;  %v1004_v12 = vunpack.c.h.bf16 %v1052_v8  ;;  %v1036_v13 = vunpack.c.h.bf16 %v1060_v9 }
 0x1ac   : > { %848 = vmatpush.msra.mxu0 %v1008_v6  ;;  %868 = vmatpush.msra.mxu1 %v1040_v7 }
 0x1ad   : > { %v1185_v16 = vpop.permute.xlu1 %1184  ;;  %v1210_v34 = vpop.permute.xlu0 %1209 }
 0x1ae   : > { %v1187_v19 = vunpack.i.h.bf16 %v1185_v16  ;;  %v1186_v20 = vunpack.i.l.bf16 %v1185_v16  ;;  %v1212_v41 = vunpack.i.h.bf16 %v1210_v34  ;;  %v1211_v42 = vunpack.i.l.bf16 %v1210_v34  ;;  %849 = vmatpush.msra.mxu0 %v1007_v10  ;;  %869 = vmatpush.msra.mxu1 %v1039_v11 }
 0x1af   : > { %v1003_v16 = vunpack.c.l.bf16 %v1052_v8  ;;  %v992_v34 = vunpack.c.h.bf16 %v1049_v30 }
 0x1b0   : > { %v657_v25 = vsel %vm487_vm2, %v1186_v20, %v1187_v19  ;;  %v658_v26 = vsel %vm487_vm2, %v1187_v19, %v1191_v14  ;;  %v647_v48 = vsel %vm487_vm2, %v1172_v45, %v1211_v42  ;;  %v648_v49 = vsel %vm487_vm2, %v1211_v42, %v1212_v41  ;;  %v1051_v14 = vld [vmem:[%s1620_s8 + $0x18] sm:$0xff]   ;;  %850 = vmatpush.msra.mxu0 %v1004_v12  ;;  %v370_v20 = vpop.f32.mrf.mxu2 }
 0x1b1   : > { %694 = vmatpush.msrb.mxu2 %v657_v25  ;;  %714 = vmatpush.msrb.mxu3 %v658_v26  ;;  %v1000_v18 = vunpack.c.h.bf16 %v1051_v14  ;;  %v1032_v19 = vunpack.c.h.bf16 %v1059_v15  ;;  %v999_v24 = vunpack.c.l.bf16 %v1051_v14  ;;  %v1031_v25 = vunpack.c.l.bf16 %v1059_v15 }
 0x1b2   : > { %870 = vmatpush.msra.mxu1 %v1036_v13  ;;  %851 = vmatpush.msra.mxu0 %v1003_v16  ;;  %v996_v26 = vunpack.c.h.bf16 %v1050_v22 }
 0x1b3   : > { %695 = vmatpush.msrb.mxu2 %v655_v31  ;;  %715 = vmatpush.msrb.mxu3 %v656_v32  ;;  %v1057_v31 = vld [vmem:[%s1620_s8 + $0x48] sm:$0xff]   ;;  %v995_v32 = vunpack.c.l.bf16 %v1050_v22 }
 0x1b4   : > { %871 = vmatpush.msra.mxu1 %v1035_v17  ;;  %852 = vmatpush.msra.mxu0 %v1000_v18  ;;  %v1023_v45 = vunpack.c.l.bf16 %v1057_v31 }
 0x1b5   : > { %696 = vmatpush.msrb.mxu2 %v653_v35  ;;  %716 = vmatpush.msrb.mxu3 %v654_v36  ;;  %v1215_v38 = vpop.permute.xlu1 %1214  ;;  %v1024_v35 = vunpack.c.h.bf16 %v1057_v31  ;;  %v586_v36 = vpop.permute.xlu0 %585 }
 0x1b6   : > { %v1217_v43 = vunpack.i.h.bf16 %v1215_v38  ;;  %v1216_v44 = vunpack.i.l.bf16 %v1215_v38  ;;  %872 = vmatpush.msra.mxu1 %v1032_v19  ;;  %853 = vmatpush.msra.mxu0 %v999_v24 }
 0x1b7   : > { %697 = vmatpush.msrb.mxu2 %v651_v39  ;;  %717 = vmatpush.msrb.mxu3 %v652_v40 }
 0x1b8   : > { %v649_v46 = vsel %vm487_vm2, %v1216_v44, %v1217_v43  ;;  %v650_v47 = vsel %vm487_vm2, %v1217_v43, %v1171_v37  ;;  %873 = vmatpush.msra.mxu1 %v1031_v25  ;;  %854 = vmatpush.msra.mxu0 %v996_v26  ;;  %v727_v43 = vld [vmem:[%s1617_s5] sm:$0xff]  ;;  %v991_v44 = vunpack.c.l.bf16 %v1049_v30 }
 0x1b9   : > { %698 = vmatpush.msrb.mxu2 %v649_v46  ;;  %718 = vmatpush.msrb.mxu3 %v650_v47  ;;  %v986_v46 = vld [vmem:[%s1620_s8] sm:$0xff]  }
 0x1ba   : > { %874 = vmatpush.msra.mxu1 %v1028_v27  ;;  %855 = vmatpush.msra.mxu0 %v995_v32  ;;  %v1056_v47 = vld [vmem:[%s1620_s8 + $0x40] sm:$0xff]  }
 0x1bb   : > { %699 = vmatpush.msrb.mxu2 %v647_v48  ;;  %719 = vmatpush.msrb.mxu3 %v648_v49  ;;  %v988_v48 = vunpack.c.h.bf16 %v986_v46  ;;  %v1020_v49 = vunpack.c.h.bf16 %v1056_v47 }
 0x1bc   : > { %875 = vmatpush.msra.mxu1 %v1027_v33  ;;  %856 = vmatpush.msra.mxu0 %v992_v34 }
 0x1bd   : > { %v1220_v50 = vpop.permute.xlu1 %1219 }
 0x1be   : > { %v1222_v51 = vunpack.i.h.bf16 %v1220_v50  ;;  %v1221_v52 = vunpack.i.l.bf16 %v1220_v50  ;;  %876 = vmatpush.msra.mxu1 %v1024_v35  ;;  %857 = vmatpush.msra.mxu0 %v991_v44  ;;  %v987_v50 = vunpack.c.l.bf16 %v986_v46 }
 0x1c0   : > { %v645_v55 = vsel %vm487_vm2, %v1221_v52, %v1222_v51  ;;  %v646_v56 = vsel %vm487_vm2, %v1222_v51, %v596_v53  ;;  %877 = vmatpush.msra.mxu1 %v1023_v45  ;;  %v1019_v51 = vunpack.c.l.bf16 %v1056_v47  ;;  %858 = vmatpush.msra.mxu0 %v988_v48 }
 0x1c1   : > { %700 = vmatpush.msrb.mxu2 %v645_v55  ;;  %720 = vmatpush.msrb.mxu3 %v646_v56 }
 0x1c2   : > { %976 = vmatmul.msk.f32.vlgmr.msrb.gmra.mxu2 %vm681_vm14, %v581_v54  ;;  %977 = vmatmul.msk.f32.vlgmr.msrb.gmra.mxu3 %vm681_vm14, %v581_v54 }
 0x1c3   : > { %878 = vmatpush.msra.mxu1 %v1020_v49  ;;  %859 = vmatpush.msra.mxu0 %v987_v50 }
 0x1c5   : > { %879 = vmatpush.msra.mxu1 %v1019_v51  ;;  %v776_v52 = vpop.permute.xlu1 %775 }
 0x245   : > { %v702_v37 = vpop.f32.mrf.mxu2  ;;  %v722_v38 = vpop.f32.mrf.mxu3 }
 0x246   : > { %v703_v39 = vadd.f32 %v702_v37, %v586_v36  ;;  %v723_v40 = vadd.f32 %v722_v38, %v586_v36 }
 0x248   : > { %v725_v41 = vmax.f32 %v703_v39, 0.0  ;;  %v726_v42 = vmax.f32 %v723_v40, 0.0 }
 0x24a   : > { %747 = vmatpush.msra.mxu2 %v725_v41  ;;  %767 = vmatpush.msra.mxu3 %v726_v42 }
 0x24b   : > { %978 = vmatmul.msk.f32.vlgmr.msra.gmra.mxu2 %vm728_vm15, %v727_v43  ;;  %979 = vmatmul.msk.f32.vlgmr.msra.gmra.mxu3 %vm728_vm15, %v727_v43 }
 0x2ce   : > { %v749_v53 = vpop.f32.mrf.mxu2  ;;  %v769_v54 = vpop.f32.mrf.mxu3 }
 0x2cf   : > { %v750_v55 = vadd.f32 %v749_v53, %v370_v20  ;;  %v770_v56 = vadd.f32 %v769_v54, %v393_v21 }
 0x2d1   : > { %v778_v57 = vadd.f32 %v776_v52, %v750_v55  ;;  %v779_v59 = vadd.f32 %v776_v52, %v770_v56 }
 0x2d3   : > { %860 = vmatmul.f32.vlgmr.msra.gmra.mxu0 %v778_v57  ;;  %880 = vmatmul.f32.vlgmr.msra.gmra.mxu1 %v779_v59 }
 0x350   : > { %v861_v60 = vpop.f32.mrf.mxu0  ;;  %v881_v61 = vpop.f32.mrf.mxu1 }
 0x351   : > { %v882_v62 = vadd.f32 %v881_v61, %v861_v60 }
 0x353   : > { %v884_v63 = vmax.f32 %v882_v62, 0.0 }
 0x355   : > { %886 = vst.msk [vmem:[%s325_s23] sm:$0xff] %vm885_vm0, %v884_v63 }
 0x356   : > { %1251 = shalt.err (!%p1248_p3)
}
 0x357   : > { %1064 = dma.vmem_to_hbm [thread:$0]  (%p1390_p5), %s901_s24, 128, %s903_s25, %s888_s26  }
 0x358 PF: > { %p1070_p4 = scmp.ge.s32.totalorder %s1286_s12, 2  ;;  %s914_s29 = sand.u32 1, %s1274_s30  }
 0x359   : > { %s915_s22 = scalar_lea.sflag [#allocation4], %s914_s29 }
 0x35a   : > { %p1067_p7 = pnand %p1070_p4, %p1394_p6 }
 0x35c   : > { %p1068_p8 = pneg %p1067_p7 }
 0x35e   : > { %1269 = dma.done.wait (%p1068_p8), %s915_s22, 128  }
 0x35f   : > { %1271 = vsyncadd (%p1068_p8), %s915_s22, 4294967168  ;;  %p19_p9 = scmp.ge.s32.totalorder %s1377_s15, 4   ;;  %s1624_s30 = smov %s1278_s10 }
 0x360   : > { %s1625_s10 = smov %s1282_s11  ;;  %s1626_s11 = smov %s1388_s18 }
 0x361   : > { %s1627_s12 = smov %s1377_s15  ;;  %21 = sbr.rel (!%p19_p9) target bundleno = 3 (0x3), region = 92 }
 0x366   :  { %921 = vsyncpa [#allocation4], 1 }
 0x367   :  { %923 = vsyncpa [#allocation4 + $0x1], 1 }

</bundles_post_ra>
